<compile_context>
chip_gen: v7x
topology: tpu7x:2x2x1
jax: 0.10.0
libtpu: 0.0.40
codegen_flags: <defaults>
</compile_context>

<pallas_src>
import functools

import jax
import jax.numpy as jnp
from jax.experimental import pallas as pl
from jax.experimental.pallas import tpu as pltpu


def _addnorm_kernel(seed_ref, x_ref, y_ref, gamma_ref, beta_ref, o_ref,
                    *, eps, inv_h, rate, training):
    x = x_ref[...]
    y = y_ref[...]

    if training and rate >= 1.0:
        # Everything dropped: dropout(Y) == 0.
        z = x.astype(jnp.float32)
    elif training and rate > 0.0:
        # Inverted dropout on Y (PyTorch nn.Dropout in train mode).
        # Integer-threshold compare on raw PRNG bits; select in the native
        # dtype, scale once after the upcast.
        # NOTE: the random stream depends on (seed, tile index), so training
        # results are reproducible only for a fixed tiling / device kind.
        pltpu.prng_seed(seed_ref[0] + pl.program_id(0))
        bits = pltpu.bitcast(pltpu.prng_random_bits(y.shape), jnp.uint32)
        thr = jnp.uint32(min(int(rate * 4294967296.0), 4294967295))
        keep = bits >= thr
        y = jnp.where(keep, y, jnp.zeros_like(y))
        z = x.astype(jnp.float32) + y.astype(jnp.float32) * jnp.float32(
            1.0 / (1.0 - rate))
    else:
        # Eval mode (or rate == 0): dropout is the identity.  Add in the
        # native dtype, single upcast.
        z = (x + y).astype(jnp.float32)

    # Single-pass mean/var over the true hidden size (block last dim == H,
    # so the reduction covers exactly H elements).
    s1 = jnp.sum(z, axis=-1, keepdims=True)
    s2 = jnp.sum(z * z, axis=-1, keepdims=True)
    mean = s1 * inv_h
    var = s2 * inv_h - mean * mean          # biased variance, like PyTorch LN
    inv = jax.lax.rsqrt(var + eps)

    g = gamma_ref[...].astype(jnp.float32)  # (1, H), broadcast over rows
    b = beta_ref[...].astype(jnp.float32)
    o_ref[...] = ((z - mean) * (inv * g) + b).astype(o_ref.dtype)


def add_norm(x, y, gamma, beta, *, dropout_rate=0.0, training=False, seed=0,
             eps=1e-5):
    """LayerNorm(dropout(Y) + X) over the last dim."""
    assert x.shape == y.shape
    orig_shape = x.shape
    H = x.shape[-1]
    rows = x.size // H
    itemsize = jnp.dtype(x.dtype).itemsize

    # Physical lane footprint of one row in VMEM (for budgeting only; the
    # BlockSpec itself uses the true H as a full-extent last dim).
    h_phys = ((H + 127) // 128) * 128
    # Sublane granularity: 8 rows for 4-byte dtypes, 16 for 2-byte dtypes.
    sub = 16 if itemsize == 2 else 8

    # Device-aware tile sizing: maximize tile size under the VMEM budget.
    # Single-TC v5e/v6e get no grid-step floor (the grid is a serial loop);
    # v7x keeps a small floor so both TensorCores stay fed, and smaller tiles
    # because it only has 64 MiB of physical VMEM per TC.
    try:
        kind = jax.devices()[0].device_kind.lower()
    except Exception:  # pragma: no cover - conservative fallback
        kind = ""
    if "v7" in kind:
        target_tile_bytes, vmem_cap, min_steps = 3 << 20, 44 << 20, 8
    elif "v6" in kind:
        target_tile_bytes, vmem_cap, min_steps = 8 << 20, 100 << 20, 1
    else:  # v5e and unknown generations
        target_tile_bytes, vmem_cap, min_steps = 6 << 20, 96 << 20, 1

    br = max(sub, (target_tile_bytes // (h_phys * itemsize)) // sub * sub)
    rows_sub = ((rows + sub - 1) // sub) * sub
    br = min(br, rows_sub)
    if min_steps > 1:
        per_step = max(sub, (pl.cdiv(rows, min_steps) + sub - 1) // sub * sub)
        br = min(br, per_step)
    num_steps = pl.cdiv(rows, br)

    xf = x.reshape(rows, H)
    yf = y.reshape(rows, H)
    gam = gamma.reshape(1, H)
    bet = beta.reshape(1, H)

    # Explicit VMEM budget: double-buffered X/Y/out tiles + f32 temporaries
    # (z, stats, store expression), plus dropout temporaries in training.
    do_dropout = training and 0.0 < dropout_rate < 1.0
    tile_bytes = br * h_phys * itemsize
    n_tmp = 7 if do_dropout else 4
    vmem_bytes = 2 * 3 * tile_bytes + n_tmp * br * h_phys * 4 + (2 << 20)
    vmem_bytes = int(min(max(vmem_bytes, 32 << 20), vmem_cap))

    kernel = functools.partial(_addnorm_kernel, eps=eps, inv_h=1.0 / H,
                               rate=dropout_rate, training=training)

    out = pl.pallas_call(
        kernel,
        out_shape=jax.ShapeDtypeStruct((rows, H), x.dtype),
        grid_spec=pltpu.PrefetchScalarGridSpec(
            num_scalar_prefetch=1,                       # dropout seed in SMEM
            grid=(num_steps,),
            in_specs=[
                pl.BlockSpec((br, H), lambda i, s: (i, 0)),   # X tile
                pl.BlockSpec((br, H), lambda i, s: (i, 0)),   # Y tile
                pl.BlockSpec((1, H), lambda i, s: (0, 0)),    # LN weight
                pl.BlockSpec((1, H), lambda i, s: (0, 0)),    # LN bias
            ],
            out_specs=pl.BlockSpec((br, H), lambda i, s: (i, 0)),
        ),
        compiler_params=pltpu.CompilerParams(
            dimension_semantics=("parallel",),
            vmem_limit_bytes=vmem_bytes),
        cost_estimate=pl.CostEstimate(
            flops=int(8 * rows * H),
            transcendentals=int(rows),
            bytes_accessed=int(3 * rows * H * itemsize)),
    )(jnp.array([seed], jnp.int32), xf, yf, gam, bet)

    return out.reshape(orig_shape)


if __name__ == "__main__":
    batch, seq, hidden = 2, 8, 32
    normalized_shape = hidden
    dropout = 0.1  # module hyperparameter; kernel run in eval mode (identity)

    key = jax.random.PRNGKey(0)
    kx, ky = jax.random.split(key)
    X = jax.random.normal(kx, (batch, seq, hidden), dtype=jnp.float32)
    Y = jax.random.normal(ky, (batch, seq, hidden), dtype=jnp.float32)

    # nn.LayerNorm default init: weight = ones, bias = zeros (deterministic).
    gamma = jnp.ones((normalized_shape,), dtype=jnp.float32)
    beta = jnp.zeros((normalized_shape,), dtype=jnp.float32)

    out = add_norm(X, Y, gamma, beta, dropout_rate=dropout, training=False)
    out = jax.block_until_ready(out)

    # Pure-JAX reference check (eval-mode dropout == identity).
    z = X + Y
    mean = jnp.mean(z, axis=-1, keepdims=True)
    var = jnp.mean((z - mean) ** 2, axis=-1, keepdims=True)
    ref = (z - mean) / jnp.sqrt(var + 1e-5) * gamma + beta
    assert jnp.allclose(out, ref, atol=1e-5, rtol=1e-5), "mismatch vs reference"

    print("KERNEL_OK")
</pallas_src>

<mosaic_0001>
module attributes {stable_mosaic.version = 11 : i64} {
  func.func @_addnorm_kernel(%arg0: i32, %arg1: memref<1xi32, #tpu.memory_space<smem>>, %arg2: memref<16x32xf32, #tpu.memory_space<vmem>>, %arg3: memref<16x32xf32, #tpu.memory_space<vmem>>, %arg4: memref<1x32xf32, #tpu.memory_space<vmem>>, %arg5: memref<1x32xf32, #tpu.memory_space<vmem>>, %arg6: memref<16x32xf32, #tpu.memory_space<vmem>>) attributes {dimension_semantics = [#tpu.dimension_semantics<parallel>], iteration_bounds = array<i64: 1>, scalar_prefetch = 1 : i64, scratch_operands = 0 : i64, tpu.core_type = #tpu.core_type<tc>, window_params = [{transform_indices = @transform_0, window_bounds = array<i64: 16, 32>}, {transform_indices = @transform_1, window_bounds = array<i64: 16, 32>}, {pipeline_mode = #tpu.pipeline_mode<synchronous>, transform_indices = @transform_2, window_bounds = array<i64: 1, 32>}, {pipeline_mode = #tpu.pipeline_mode<synchronous>, transform_indices = @transform_3, window_bounds = array<i64: 1, 32>}, {transform_indices = @transform_4, window_bounds = array<i64: 16, 32>}]} {
    %c0 = arith.constant 0 : index
    %c0_0 = arith.constant 0 : index
    %0 = vector.load %arg2[%c0, %c0_0] : memref<16x32xf32, #tpu.memory_space<vmem>>, vector<16x32xf32>
    %c0_1 = arith.constant 0 : index
    %c0_2 = arith.constant 0 : index
    %1 = vector.load %arg3[%c0_1, %c0_2] : memref<16x32xf32, #tpu.memory_space<vmem>>, vector<16x32xf32>
    %2 = arith.addf %0, %1 : vector<16x32xf32>
    %cst = arith.constant dense<0.000000e+00> : vector<16xf32>
    %3 = vector.multi_reduction <add>, %2, %cst [1] : vector<16x32xf32> to vector<16xf32>
    %4 = vector.shape_cast %3 : vector<16xf32> to vector<16x1xf32>
    %5 = arith.mulf %2, %2 : vector<16x32xf32>
    %cst_3 = arith.constant dense<0.000000e+00> : vector<16xf32>
    %6 = vector.multi_reduction <add>, %5, %cst_3 [1] : vector<16x32xf32> to vector<16xf32>
    %7 = vector.shape_cast %6 : vector<16xf32> to vector<16x1xf32>
    %cst_4 = arith.constant 3.125000e-02 : f32
    %8 = vector.broadcast %cst_4 : f32 to vector<16x1xf32>
    %9 = arith.mulf %4, %8 : vector<16x1xf32>
    %cst_5 = arith.constant 3.125000e-02 : f32
    %10 = vector.broadcast %cst_5 : f32 to vector<16x1xf32>
    %11 = arith.mulf %7, %10 : vector<16x1xf32>
    %12 = arith.mulf %9, %9 : vector<16x1xf32>
    %13 = arith.subf %11, %12 : vector<16x1xf32>
    %cst_6 = arith.constant 9.99999974E-6 : f32
    %14 = vector.broadcast %cst_6 : f32 to vector<16x1xf32>
    %15 = arith.addf %13, %14 : vector<16x1xf32>
    %16 = math.rsqrt %15 : vector<16x1xf32>
    %c0_7 = arith.constant 0 : index
    %c0_8 = arith.constant 0 : index
    %17 = vector.load %arg4[%c0_7, %c0_8] : memref<1x32xf32, #tpu.memory_space<vmem>>, vector<1x32xf32>
    %c0_9 = arith.constant 0 : index
    %c0_10 = arith.constant 0 : index
    %18 = vector.load %arg5[%c0_9, %c0_10] : memref<1x32xf32, #tpu.memory_space<vmem>>, vector<1x32xf32>
    %19 = vector.broadcast %9 : vector<16x1xf32> to vector<16x32xf32>
    %20 = arith.subf %2, %19 : vector<16x32xf32>
    %21 = vector.broadcast %16 : vector<16x1xf32> to vector<16x32xf32>
    %22 = vector.broadcast %17 : vector<1x32xf32> to vector<16x32xf32>
    %23 = arith.mulf %21, %22 : vector<16x32xf32>
    %24 = arith.mulf %20, %23 : vector<16x32xf32>
    %25 = vector.broadcast %18 : vector<1x32xf32> to vector<16x32xf32>
    %26 = arith.addf %24, %25 : vector<16x32xf32>
    %c0_11 = arith.constant 0 : index
    %c0_12 = arith.constant 0 : index
    %27 = vector.load %arg6[%c0_11, %c0_12] : memref<16x32xf32, #tpu.memory_space<vmem>>, vector<16x32xf32>
    tpu.vector_store %arg6[%c0_11, %c0_12], %26 {strides = array<i32>} : memref<16x32xf32, #tpu.memory_space<vmem>>, vector<16x32xf32>,
    return
  }
  func.func @transform_0(%arg0: i32, %arg1: memref<1xi32, #tpu.memory_space<smem>>) -> (i32, i32) {
    %c0_i32 = arith.constant 0 : i32
    %c0_i32_0 = arith.constant 0 : i32
    return %arg0, %c0_i32 : i32, i32
  }
  func.func @transform_1(%arg0: i32, %arg1: memref<1xi32, #tpu.memory_space<smem>>) -> (i32, i32) {
    %c0_i32 = arith.constant 0 : i32
    %c0_i32_0 = arith.constant 0 : i32
    return %arg0, %c0_i32 : i32, i32
  }
  func.func @transform_2(%arg0: i32, %arg1: memref<1xi32, #tpu.memory_space<smem>>) -> (i32, i32) {
    %c0_i32 = arith.constant 0 : i32
    %c0_i32_0 = arith.constant 0 : i32
    %c0_i32_1 = arith.constant 0 : i32
    return %c0_i32, %c0_i32_0 : i32, i32
  }
  func.func @transform_3(%arg0: i32, %arg1: memref<1xi32, #tpu.memory_space<smem>>) -> (i32, i32) {
    %c0_i32 = arith.constant 0 : i32
    %c0_i32_0 = arith.constant 0 : i32
    %c0_i32_1 = arith.constant 0 : i32
    return %c0_i32, %c0_i32_0 : i32, i32
  }
  func.func @transform_4(%arg0: i32, %arg1: memref<1xi32, #tpu.memory_space<smem>>) -> (i32, i32) {
    %c0_i32 = arith.constant 0 : i32
    %c0_i32_0 = arith.constant 0 : i32
    return %arg0, %c0_i32 : i32, i32
  }
}

</mosaic_0001>

<bundles_post_ra>
// kernel: tpu_custom_call.1
= control target key start
LH: loop header
LB: loop body
LE: loop exit
PB: predicated region body
PF: predicated region fallthrough
CT: control target
= control target key end

     0   :  { %11 = vsyncpa [#allocation5], 0  ;;  %s298_s0 = inlined_call_operand.<no memory space> [shape: s32[1], index: 0, kind: input, shape index: {}]   ;;  %s299_s1 = inlined_call_operand.hbm [shape: f32[16,32], index: 1, kind: input, shape index: {}]   ;;  %s300_s2 = inlined_call_operand.hbm [shape: f32[16,32], index: 2, kind: input, shape index: {}]   ;;  %s301_s3 = inlined_call_operand.vmem [shape: f32[1,32], index: 3, kind: input, shape index: {}]   ;;  %s302_s4 = inlined_call_operand.vmem [shape: f32[1,32], index: 4, kind: input, shape index: {}]   ;;  %s303_s5 = inlined_call_operand.hbm [shape: f32[16,32], index: 5, kind: output, shape index: {}]  }
   0x1   :  { %12 = vsyncpa [#allocation8], 0 }
   0x2   :  { %13 = vsyncpa [#allocation6], 0  ;;  %s206_s18 = smov [#allocation4]   ;;  %s134_s21 = scalar_lea.hbm %s299_s1, 256 }
   0x3   :  { %s19_s0 = sshll.u32 %s206_s18, 4  ;;  %p135_p0 = scmp.ne.s32.totalorder %s299_s1, %s134_s21  ;;  %s20_s0 = int_to_ptr.vmem [resolvable:$true] %s19_s0 }
   0x4   :  { %p138_p1 = scmp.lt.u32.totalorder %s134_s21, %s299_s1 }
   0x6   :  { %p140_p2 = pnand %p138_p1, %p135_p0 }
   0x8   :  { %143 = shalt.err (!%p140_p2)
}
   0x9   :  { %s144_s26 = scalar_lea.vmem %s20_s0, 256  ;;  %p149_p4 = scmp.lt.s32.totalorder %s20_s0, %s20_s0 }
   0xa   :  { %p145_p3 = scmp.ne.s32.totalorder %s20_s0, %s144_s26  ;;  %p150_p5 = scmp.lt.s32.totalorder %s144_s26, %s144_s26 }
   0xc   :  { %p151_p6 = por %p150_p5, %p149_p4 }
   0xe   :  { %p152_p7 = pnand %p151_p6, %p145_p3 }
  0x10   :  { %155 = shalt.err (!%p152_p7)
}
  0x11   :  { %s207_s27 = smov 128   ;;  %s208_s28 = smov 8  }
  0x12   :  { %25 = dma.hbm_to_vmem [thread:$0]  %s299_s1, 256, %s20_s0, [#allocation5], %s207_s27, %s207_s27, %s208_s28  }
  0x13   :  { %s209_s6 = smov [#allocation7]   ;;  %s156_s10 = scalar_lea.hbm %s300_s2, 256 }
  0x14   :  { %s31_s7 = sshll.u32 %s209_s6, 4  ;;  %p157_p8 = scmp.ne.s32.totalorder %s300_s2, %s156_s10  ;;  %s32_s7 = int_to_ptr.vmem [resolvable:$true] %s31_s7 }
  0x15   :  { %p160_p9 = scmp.lt.u32.totalorder %s156_s10, %s300_s2 }
  0x17   :  { %p162_p10 = pnand %p160_p9, %p157_p8 }
  0x19   :  { %165 = shalt.err (!%p162_p10)
}
  0x1a   :  { %s166_s15 = scalar_lea.vmem %s32_s7, 256  ;;  %p171_p12 = scmp.lt.s32.totalorder %s32_s7, %s32_s7 }
  0x1b   :  { %p167_p11 = scmp.ne.s32.totalorder %s32_s7, %s166_s15  ;;  %p172_p13 = scmp.lt.s32.totalorder %s166_s15, %s166_s15 }
  0x1d   :  { %p173_p0 = por %p172_p13, %p171_p12 }
  0x1f   :  { %p174_p1 = pnand %p173_p0, %p167_p11 }
  0x21   :  { %177 = shalt.err (!%p174_p1)
}
  0x22   :  { %37 = dma.hbm_to_vmem [thread:$0]  %s300_s2, 256, %s32_s7, [#allocation8], %s207_s27, %s207_s27, %s208_s28  }
  0x23   :  { %200 = dma.done.wait [#allocation5], 256  }
  0x24   :  { %201 = vsyncadd [#allocation5], 4294967040 }
  0x25   :  { %202 = dma.done.wait [#allocation8], 256  }
  0x26   :  { %203 = vsyncadd [#allocation8], 4294967040  ;;  %v48_v0 = vld [vmem:[#allocation4] sm:$0xff]  ;;  %v50_v1 = vld [vmem:[#allocation7] sm:$0xff]  ;;  %vm54_vm0 = vcmask 261120   ;;  %s210_s19 = smov [#allocation9]  }
  0x27   :  { %v49_v2 = vld [vmem:[#allocation4 + $0x8] sm:$0xff]  ;;  %v52_v3 = vadd.f32 %v50_v1, %v48_v0  ;;  %v51_v4 = vld [vmem:[#allocation7 + $0x8] sm:$0xff]  ;;  %v123_v26 = vld [vmem:[%s301_s3] ss:$0 sm:$0xff]  ;;  %s110_s20 = sshll.u32 %s210_s19, 4  ;;  %s111_s20 = int_to_ptr.vmem [resolvable:$true] %s110_s20 }
  0x28   :  { %v53_v5 = vadd.f32 %v51_v4, %v49_v2  ;;  %v124_v30 = vld [vmem:[%s302_s4] ss:$0 sm:$0xff]  ;;  %s178_s3 = scalar_lea.vmem %s111_s20, 256  ;;  %p183_p3 = scmp.lt.s32.totalorder %s111_s20, %s111_s20 }
  0x29   :  { %v55_v6 = vsel %vm54_vm0, %v52_v3, 0.0  ;;  %v61_v7 = vmul.f32 %v52_v3, %v52_v3  ;;  %p179_p2 = scmp.ne.s32.totalorder %s111_s20, %s178_s3  ;;  %p184_p4 = scmp.lt.s32.totalorder %s178_s3, %s178_s3 }
  0x2a   :  { %56 = vadd.xlane.f32.xlu0 %v55_v6  ;;  %v62_v8 = vmul.f32 %v53_v5, %v53_v5  ;;  %v58_v10 = vsel %vm54_vm0, %v53_v5, 0.0 }
  0x2b   :  { %v63_v9 = vsel %vm54_vm0, %v61_v7, 0.0  ;;  %p185_p5 = por %p184_p4, %p183_p3 }
  0x2c   :  { %64 = vadd.xlane.f32.xlu1 %v63_v9  ;;  %v66_v11 = vsel %vm54_vm0, %v62_v8, 0.0 }
  0x2d   :  { %p186_p6 = pnand %p185_p5, %p179_p2 }
  0x2e   :  { %59 = vadd.xlane.f32.xlu0 %v58_v10 }
  0x30   :  { %67 = vadd.xlane.f32.xlu1 %v66_v11 }
  0xb7   :  { %v57_v12 = vpop.xlane.xlu0 %56 }
  0xb8   :  { %v69_v13 = vmul.f32 0.03125, %v57_v12 }
  0xb9   :  { %v65_v14 = vpop.xlane.xlu1 %64 }
  0xba   :  { %v73_v15 = vmul.f32 %v69_v13, %v69_v13  ;;  %v71_v16 = vmul.f32 0.03125, %v65_v14  ;;  %v83_v28 = vsub.f32 %v52_v3, %v69_v13 }
  0xbb   :  { %v60_v17 = vpop.xlane.xlu0 %59 }
  0xbc   :  { %v75_v18 = vsub.f32 %v71_v16, %v73_v15  ;;  %v70_v19 = vmul.f32 0.03125, %v60_v17 }
  0xbd   :  { %v68_v20 = vpop.xlane.xlu1 %67 }
  0xbe   :  { %v77_v21 = vadd.f32 1e-05, %v75_v18  ;;  %v74_v22 = vmul.f32 %v70_v19, %v70_v19  ;;  %v72_v23 = vmul.f32 0.03125, %v68_v20  ;;  %v84_v33 = vsub.f32 %v53_v5, %v70_v19 }
  0xc0   :  { %130 = vrsqrt.f32 %v77_v21  ;;  %v76_v24 = vsub.f32 %v72_v23, %v74_v22 }
  0xc2   :  { %v78_v25 = vadd.f32 1e-05, %v76_v24 }
  0xc4   :  { %132 = vrsqrt.f32 %v78_v25 }
  0xca   :  { %v131_v27 = vpop.eup %130 }
  0xcb   :  { %v91_v29 = vmul.f32 %v131_v27, %v123_v26 }
  0xcd   :  { %v93_v31 = vmul.f32 %v91_v29, %v83_v28 }
  0xce   :  { %v133_v32 = vpop.eup %132 }
  0xcf   :  { %v92_v34 = vmul.f32 %v133_v32, %v123_v26  ;;  %v101_v35 = vadd.f32 %v124_v30, %v93_v31 }
  0xd1   :  { %v94_v36 = vmul.f32 %v92_v34, %v84_v33  ;;  %103 = vst.msk [vmem:[#allocation9] sm:$0xff] %vm54_vm0, %v101_v35 }
  0xd3   :  { %v102_v37 = vadd.f32 %v124_v30, %v94_v36 }
  0xd5   :  { %104 = vst.msk [vmem:[#allocation9 + $0x8] sm:$0xff] %vm54_vm0, %v102_v37 }
  0xd6   :  { %189 = shalt.err (!%p186_p6)
}
  0xd7   :  { %s190_s22 = scalar_lea.hbm %s303_s5, 256 }
  0xd8   :  { %p191_p7 = scmp.ne.s32.totalorder %s303_s5, %s190_s22  ;;  %p194_p8 = scmp.lt.u32.totalorder %s190_s22, %s303_s5 }
  0xda   :  { %p196_p9 = pnand %p194_p8, %p191_p7 }
  0xdc   :  { %199 = shalt.err (!%p196_p9)
}
  0xdd   :  { %116 = dma.vmem_to_hbm [thread:$0]  %s111_s20, 256, %s303_s5, [#allocation6], %s207_s27, %s207_s27, %s208_s28  }
  0xde   :  { %204 = dma.done.wait [#allocation6], 256  }
  0xdf   :  { %205 = vsyncadd [#allocation6], 4294967040 }
  0xe0   :  { %120 = vsyncpa [#allocation5], 1 }
  0xe1   :  { %121 = vsyncpa [#allocation8], 1 }
  0xe2   :  { %122 = vsyncpa [#allocation6], 1 }

</bundles_post_ra>
